<compile_context>
chip_gen: v7x
topology: tpu7x:2x2x1
jax: 0.10.0
libtpu: 0.0.40
codegen_flags: <defaults>
</compile_context>

<pallas_src>
import functools
import math

import jax
import jax.numpy as jnp
import numpy as np
from jax.experimental import pallas as pl
from jax.experimental.pallas import tpu as pltpu


def _sinusoidal_pe_kernel(pm_ref, w_ref, out_ref, *, terms):
    """out[r, :] = sin( sum_j pm[r, j] * W[j, :] ), cast to out dtype.

    pm packs, per output row, the masked positions of the k folded tokens
    followed by their padding masks (2k columns total).  W is the small
    block-diagonal expansion table: rows 0..k-1 carry the frequency table for
    each folded token's lane group, rows k..2k-1 carry the pi/2 phase that
    turns sin into cos on the second half of each embedding.  Padding tokens
    arrive with pos == 0 and mask == 0, so their angle is identically 0 and
    sin(0) == 0 reproduces the zeroed weights[padding_idx] row — no separate
    mask multiply, no concatenate, one transcendental per output element.
    """
    pm = pm_ref[...]                      # (ts, 2k) f32
    w = w_ref[...]                        # (2k, lane_width) f32
    angle = pm[:, 0:1] * w[0:1, :]        # broadcast (ts,1)*(1,L) -> (ts,L)
    for j in range(1, terms):             # terms = 2k (<= 32), unrolled
        angle = angle + pm[:, j:j + 1] * w[j:j + 1, :]
    out_ref[...] = jnp.sin(angle).astype(out_ref.dtype)


def _tpu_kind():
    try:
        return jax.devices()[0].device_kind.lower()
    except Exception:
        return ""


def _target_block_bytes():
    kind = _tpu_kind()
    # v7x: ~3.2 TB/s per-TC HBM -> a 4 MiB writeback (~1.3 us) barely hides the
    # ~0.35 us fixed per-grid-step overhead, so use bigger blocks there.
    # v5e/v6e: a 4 MiB DMA already takes 3-5 us and buries the overhead.
    if "v7" in kind or "7x" in kind:
        return 8 << 20
    return 4 << 20


def _choose_row_tile(n_rows, lane_width, out_dtype):
    """Rows per output block.  Rounded to the sublane-packing granule of the
    output dtype (8 for 4-byte, 16 for 2-byte, 32 for 1-byte) so stores stay
    unmasked; a full-extent block is always legal."""
    itemsize = jnp.dtype(out_dtype).itemsize
    sub = {4: 8, 2: 16, 1: 32}.get(itemsize, 8)
    target_rows = max(sub, _target_block_bytes() // max(1, lane_width * itemsize))
    if n_rows <= target_rows:
        return n_rows
    return max(sub, (target_rows // sub) * sub)


def _fold_factor(embedding_dim, n_tokens):
    """k consecutive tokens folded into one output row so k*D % 128 == 0."""
    if embedding_dim >= 128:
        return 1
    k = 128 // math.gcd(embedding_dim, 128)
    if k <= 16 and n_tokens % k == 0:      # bound unrolled terms; need clean fold
        return k
    return 1


def sinusoidal_positional_embedding(tokens, embedding_dim, padding_idx=0,
                                    left_pad=0, out_dtype=jnp.float32):
    """tokens: int [bsz, seq_len] -> [bsz, seq_len, embedding_dim]."""
    assert embedding_dim >= 2, "embedding_dim must be >= 2"
    tokens = tokens.astype(jnp.int32)
    B, S = tokens.shape
    n = B * S
    half = embedding_dim // 2

    # ---- static tables (trace-time numpy) -----------------------------------
    # f_j = exp(-j * ln(10000)/(h-1)); max(h-1,1) guards h == 1 (the reference
    # divides by zero there — documented semantic difference).
    scale = math.log(10000.0) / max(half - 1, 1)
    freq = np.exp(-scale * np.arange(half, dtype=np.float64)).astype(np.float32)
    freq_ext = np.zeros((embedding_dim,), np.float32)
    freq_ext[:half] = freq
    freq_ext[half:2 * half] = freq                    # cos half shares freqs
    phase = np.zeros((embedding_dim,), np.float32)
    phase[half:2 * half] = np.float32(math.pi / 2)    # sin(x + pi/2) == cos(x)
    # odd embedding_dim: freq_ext[-1] == phase[-1] == 0 -> trailing zero column.

    # ---- lane folding setup --------------------------------------------------
    k = _fold_factor(embedding_dim, n)
    lane_width = k * embedding_dim
    n_rows = n // k

    w_np = np.zeros((2 * k, lane_width), np.float32)  # block-diagonal expansion
    for j in range(k):
        w_np[j, j * embedding_dim:(j + 1) * embedding_dim] = freq_ext
        w_np[k + j, j * embedding_dim:(j + 1) * embedding_dim] = phase
    w = jnp.asarray(w_np)

    # ---- tiny XLA-side per-token prep (B*S scalars vs B*S*D outputs) --------
    mask = tokens != padding_idx
    positions = jnp.broadcast_to(
        jnp.arange(padding_idx + 1, padding_idx + 1 + S, dtype=jnp.int32)[None, :],
        (B, S))
    if left_pad:
        nonpad = jnp.sum(mask.astype(jnp.int32), axis=1, keepdims=True)
        positions = positions - S + nonpad
    maskf = mask.astype(jnp.float32)
    posm = positions.astype(jnp.float32) * maskf      # padding -> position 0
    pm = jnp.concatenate(                             # single merged input stream
        [posm.reshape(n_rows, k), maskf.reshape(n_rows, k)], axis=1)  # (n_rows, 2k)

    # ---- Pallas kernel over row tiles of the lane-dense output --------------
    ts = _choose_row_tile(n_rows, lane_width, out_dtype)
    grid = (pl.cdiv(n_rows, ts),)
    out_block_bytes = ts * lane_width * jnp.dtype(out_dtype).itemsize
    # 2x double-buffered output blocks + inputs, with headroom; <= 64 MiB so it
    # is safe on v7x's physical VMEM and above v5e's 16 MiB default scoped cap.
    vmem_limit = int(min(64 << 20, max(32 << 20, 4 * out_block_bytes)))

    kernel = functools.partial(_sinusoidal_pe_kernel, terms=2 * k)
    out_flat = pl.pallas_call(
        kernel,
        grid=grid,
        in_specs=[
            pl.BlockSpec((ts, 2 * k), lambda i: (i, 0)),           # pos | mask
            pl.BlockSpec((2 * k, lane_width), lambda i: (0, 0)),   # expansion W
        ],
        out_specs=pl.BlockSpec((ts, lane_width), lambda i: (i, 0)),
        out_shape=jax.ShapeDtypeStruct((n_rows, lane_width), out_dtype),
        compiler_params=pltpu.CompilerParams(
            dimension_semantics=("parallel",),
            vmem_limit_bytes=vmem_limit),
    )(pm, w)

    # Contiguous reshape back to (B, S, D) — same bytes, free.
    return out_flat.reshape(B, S, embedding_dim)


def _reference(tokens, embedding_dim, padding_idx=0, left_pad=0):
    """Pure numpy re-implementation of the PyTorch forward for verification."""
    tokens = np.asarray(tokens)
    B, S = tokens.shape
    half = embedding_dim // 2
    scale = math.log(10000.0) / max(half - 1, 1)
    freq = np.exp(-scale * np.arange(half, dtype=np.float64))
    mask = tokens != padding_idx
    positions = np.broadcast_to(
        np.arange(padding_idx + 1, padding_idx + 1 + S), (B, S)).astype(np.int64).copy()
    if left_pad:
        positions = positions - S + mask.sum(axis=1, keepdims=True)
    angle = positions[..., None].astype(np.float64) * freq
    emb = np.concatenate([np.sin(angle), np.cos(angle)], axis=-1)
    if embedding_dim % 2 == 1:
        emb = np.concatenate([emb, np.zeros((B, S, 1))], axis=-1)
    emb = np.where(mask[..., None], emb, 0.0)
    return emb.astype(np.float32)


if __name__ == "__main__":
    B, S, D = 2, 8, 32
    padding_idx = 0

    key = jax.random.PRNGKey(0)
    # Token ids in [1, 20); id 0 == padding_idx only where explicitly set.
    tokens = jax.random.randint(key, (B, S), 1, 20, dtype=jnp.int32)

    # Right-padded rows, left_pad=0 (exercises the folded k=4, 128-lane path).
    tok_right = tokens.at[0, -2:].set(padding_idx).at[1, -1:].set(padding_idx)
    out = jax.block_until_ready(
        sinusoidal_positional_embedding(tok_right, D, padding_idx, left_pad=0))
    assert out.shape == (B, S, D), out.shape
    ref = _reference(np.asarray(tok_right), D, padding_idx, left_pad=0)
    np.testing.assert_allclose(np.asarray(out), ref, atol=1e-5, rtol=1e-5)

    # Left-padded rows, left_pad=1.
    tok_left = tokens.at[0, :2].set(padding_idx).at[1, :1].set(padding_idx)
    out = jax.block_until_ready(
        sinusoidal_positional_embedding(tok_left, D, padding_idx, left_pad=1))
    ref = _reference(np.asarray(tok_left), D, padding_idx, left_pad=1)
    np.testing.assert_allclose(np.asarray(out), ref, atol=1e-5, rtol=1e-5)

    # Odd embedding dim exercises the unfolded (k=1) path + trailing zero column.
    D_odd = 33
    out = jax.block_until_ready(
        sinusoidal_positional_embedding(tok_right, D_odd, padding_idx, left_pad=0))
    assert out.shape == (B, S, D_odd), out.shape
    ref = _reference(np.asarray(tok_right), D_odd, padding_idx, left_pad=0)
    np.testing.assert_allclose(np.asarray(out), ref, atol=1e-5, rtol=1e-5)

    print("KERNEL_OK")
</pallas_src>

<mosaic_0001>
module attributes {stable_mosaic.version = 11 : i64} {
  func.func @_sinusoidal_pe_kernel(%arg0: i32, %arg1: memref<4x8xf32, #tpu.memory_space<vmem>>, %arg2: memref<8x128xf32, #tpu.memory_space<vmem>>, %arg3: memref<4x128xf32, #tpu.memory_space<vmem>>) attributes {dimension_semantics = [#tpu.dimension_semantics<parallel>], iteration_bounds = array<i64: 1>, scalar_prefetch = 0 : i64, scratch_operands = 0 : i64, tpu.core_type = #tpu.core_type<tc>, window_params = [{transform_indices = @transform_0, window_bounds = array<i64: 4, 8>}, {pipeline_mode = #tpu.pipeline_mode<synchronous>, transform_indices = @transform_1, window_bounds = array<i64: 8, 128>}, {transform_indices = @transform_2, window_bounds = array<i64: 4, 128>}]} {
    %c0 = arith.constant 0 : index
    %c0_0 = arith.constant 0 : index
    %0 = vector.load %arg1[%c0, %c0_0] : memref<4x8xf32, #tpu.memory_space<vmem>>, vector<4x8xf32>
    %c0_1 = arith.constant 0 : index
    %c0_2 = arith.constant 0 : index
    %1 = vector.load %arg2[%c0_1, %c0_2] : memref<8x128xf32, #tpu.memory_space<vmem>>, vector<8x128xf32>
    %2 = vector.extract_strided_slice %0 {offsets = [0, 0], sizes = [4, 1], strides = [1, 1]} : vector<4x8xf32> to vector<4x1xf32>
    %3 = vector.extract_strided_slice %1 {offsets = [0, 0], sizes = [1, 128], strides = [1, 1]} : vector<8x128xf32> to vector<1x128xf32>
    %4 = vector.broadcast %2 : vector<4x1xf32> to vector<4x128xf32>
    %5 = vector.broadcast %3 : vector<1x128xf32> to vector<4x128xf32>
    %6 = arith.mulf %4, %5 : vector<4x128xf32>
    %7 = vector.extract_strided_slice %0 {offsets = [0, 1], sizes = [4, 1], strides = [1, 1]} : vector<4x8xf32> to vector<4x1xf32>
    %8 = vector.extract_strided_slice %1 {offsets = [1, 0], sizes = [1, 128], strides = [1, 1]} : vector<8x128xf32> to vector<1x128xf32>
    %9 = vector.broadcast %7 : vector<4x1xf32> to vector<4x128xf32>
    %10 = vector.broadcast %8 : vector<1x128xf32> to vector<4x128xf32>
    %11 = arith.mulf %9, %10 : vector<4x128xf32>
    %12 = arith.addf %6, %11 : vector<4x128xf32>
    %13 = vector.extract_strided_slice %0 {offsets = [0, 2], sizes = [4, 1], strides = [1, 1]} : vector<4x8xf32> to vector<4x1xf32>
    %14 = vector.extract_strided_slice %1 {offsets = [2, 0], sizes = [1, 128], strides = [1, 1]} : vector<8x128xf32> to vector<1x128xf32>
    %15 = vector.broadcast %13 : vector<4x1xf32> to vector<4x128xf32>
    %16 = vector.broadcast %14 : vector<1x128xf32> to vector<4x128xf32>
    %17 = arith.mulf %15, %16 : vector<4x128xf32>
    %18 = arith.addf %12, %17 : vector<4x128xf32>
    %19 = vector.extract_strided_slice %0 {offsets = [0, 3], sizes = [4, 1], strides = [1, 1]} : vector<4x8xf32> to vector<4x1xf32>
    %20 = vector.extract_strided_slice %1 {offsets = [3, 0], sizes = [1, 128], strides = [1, 1]} : vector<8x128xf32> to vector<1x128xf32>
    %21 = vector.broadcast %19 : vector<4x1xf32> to vector<4x128xf32>
    %22 = vector.broadcast %20 : vector<1x128xf32> to vector<4x128xf32>
    %23 = arith.mulf %21, %22 : vector<4x128xf32>
    %24 = arith.addf %18, %23 : vector<4x128xf32>
    %25 = vector.extract_strided_slice %0 {offsets = [0, 4], sizes = [4, 1], strides = [1, 1]} : vector<4x8xf32> to vector<4x1xf32>
    %26 = vector.extract_strided_slice %1 {offsets = [4, 0], sizes = [1, 128], strides = [1, 1]} : vector<8x128xf32> to vector<1x128xf32>
    %27 = vector.broadcast %25 : vector<4x1xf32> to vector<4x128xf32>
    %28 = vector.broadcast %26 : vector<1x128xf32> to vector<4x128xf32>
    %29 = arith.mulf %27, %28 : vector<4x128xf32>
    %30 = arith.addf %24, %29 : vector<4x128xf32>
    %31 = vector.extract_strided_slice %0 {offsets = [0, 5], sizes = [4, 1], strides = [1, 1]} : vector<4x8xf32> to vector<4x1xf32>
    %32 = vector.extract_strided_slice %1 {offsets = [5, 0], sizes = [1, 128], strides = [1, 1]} : vector<8x128xf32> to vector<1x128xf32>
    %33 = vector.broadcast %31 : vector<4x1xf32> to vector<4x128xf32>
    %34 = vector.broadcast %32 : vector<1x128xf32> to vector<4x128xf32>
    %35 = arith.mulf %33, %34 : vector<4x128xf32>
    %36 = arith.addf %30, %35 : vector<4x128xf32>
    %37 = vector.extract_strided_slice %0 {offsets = [0, 6], sizes = [4, 1], strides = [1, 1]} : vector<4x8xf32> to vector<4x1xf32>
    %38 = vector.extract_strided_slice %1 {offsets = [6, 0], sizes = [1, 128], strides = [1, 1]} : vector<8x128xf32> to vector<1x128xf32>
    %39 = vector.broadcast %37 : vector<4x1xf32> to vector<4x128xf32>
    %40 = vector.broadcast %38 : vector<1x128xf32> to vector<4x128xf32>
    %41 = arith.mulf %39, %40 : vector<4x128xf32>
    %42 = arith.addf %36, %41 : vector<4x128xf32>
    %43 = vector.extract_strided_slice %0 {offsets = [0, 7], sizes = [4, 1], strides = [1, 1]} : vector<4x8xf32> to vector<4x1xf32>
    %44 = vector.extract_strided_slice %1 {offsets = [7, 0], sizes = [1, 128], strides = [1, 1]} : vector<8x128xf32> to vector<1x128xf32>
    %45 = vector.broadcast %43 : vector<4x1xf32> to vector<4x128xf32>
    %46 = vector.broadcast %44 : vector<1x128xf32> to vector<4x128xf32>
    %47 = arith.mulf %45, %46 : vector<4x128xf32>
    %48 = arith.addf %42, %47 : vector<4x128xf32>
    %49 = math.sin %48 : vector<4x128xf32>
    %c0_3 = arith.constant 0 : index
    %c0_4 = arith.constant 0 : index
    %50 = vector.load %arg3[%c0_3, %c0_4] : memref<4x128xf32, #tpu.memory_space<vmem>>, vector<4x128xf32>
    tpu.vector_store %arg3[%c0_3, %c0_4], %49 {strides = array<i32>} : memref<4x128xf32, #tpu.memory_space<vmem>>, vector<4x128xf32>,
    return
  }
  func.func @transform_0(%arg0: i32) -> (i32, i32) {
    %c0_i32 = arith.constant 0 : i32
    %c0_i32_0 = arith.constant 0 : i32
    return %arg0, %c0_i32 : i32, i32
  }
  func.func @transform_1(%arg0: i32) -> (i32, i32) {
    %c0_i32 = arith.constant 0 : i32
    %c0_i32_0 = arith.constant 0 : i32
    %c0_i32_1 = arith.constant 0 : i32
    return %c0_i32, %c0_i32_0 : i32, i32
  }
  func.func @transform_2(%arg0: i32) -> (i32, i32) {
    %c0_i32 = arith.constant 0 : i32
    %c0_i32_0 = arith.constant 0 : i32
    return %arg0, %c0_i32 : i32, i32
  }
}

</mosaic_0001>

<bundles_post_ra>
// kernel: tpu_custom_call.1
= control target key start
LH: loop header
LB: loop body
LE: loop exit
PB: predicated region body
PF: predicated region fallthrough
CT: control target
= control target key end

     0   :  { %7 = vsyncpa [#allocation3], 0  ;;  %s438_s0 = inlined_call_operand.hbm [shape: f32[4,8], index: 0, kind: input, shape index: {}]   ;;  %s439_s1 = inlined_call_operand.hbm [shape: f32[8,128], index: 1, kind: input, shape index: {}]   ;;  %s440_s2 = inlined_call_operand.hbm [shape: f32[4,128], index: 2, kind: output, shape index: {}]  }
   0x1   :  { %8 = vsyncpa [#allocation6], 0 }
   0x2   :  { %9 = vsyncpa [#allocation4], 0  ;;  %s349_s9 = smov [#allocation2]   ;;  %s350_s11 = smov [#allocation5]  }
   0x3   :  { %s16_s10 = sshll.u32 %s349_s9, 4  ;;  %s26_s12 = sshll.u32 %s350_s11, 4  ;;  %s17_s10 = int_to_ptr.vmem [resolvable:$true] %s16_s10  ;;  %s27_s12 = int_to_ptr.vmem [resolvable:$true] %s26_s12 }
   0x4   :  { %s277_s15 = scalar_lea.hbm %s438_s0, 64 }
   0x5   :  { %p278_p0 = scmp.ne.s32.totalorder %s438_s0, %s277_s15  ;;  %p281_p1 = scmp.lt.u32.totalorder %s277_s15, %s438_s0 }
   0x7   :  { %p283_p2 = pnand %p281_p1, %p278_p0 }
   0x9   :  { %286 = shalt.err (!%p283_p2)
}
   0xa   :  { %s287_s20 = scalar_lea.vmem %s17_s10, 64  ;;  %p292_p4 = scmp.lt.s32.totalorder %s17_s10, %s17_s10 }
   0xb   :  { %p288_p3 = scmp.ne.s32.totalorder %s17_s10, %s287_s20  ;;  %p293_p5 = scmp.lt.s32.totalorder %s287_s20, %s287_s20 }
   0xd   :  { %p294_p6 = por %p293_p5, %p292_p4 }
   0xf   :  { %p295_p7 = pnand %p294_p6, %p288_p3 }
  0x11   :  { %298 = shalt.err (!%p295_p7)
}
  0x12   :  { %19 = dma.hbm_to_vmem [thread:$0]  %s438_s0, 64, %s17_s10, [#allocation3]  }
  0x13   :  { %s299_s25 = scalar_lea.hbm %s439_s1, 128 }
  0x14   :  { %p300_p8 = scmp.ne.s32.totalorder %s439_s1, %s299_s25  ;;  %p303_p9 = scmp.lt.u32.totalorder %s299_s25, %s439_s1 }
  0x16   :  { %p305_p10 = pnand %p303_p9, %p300_p8 }
  0x18   :  { %308 = shalt.err (!%p305_p10)
}
  0x19   :  { %s309_s30 = scalar_lea.vmem %s27_s12, 128  ;;  %p314_p12 = scmp.lt.s32.totalorder %s27_s12, %s27_s12 }
  0x1a   :  { %p310_p11 = scmp.ne.s32.totalorder %s27_s12, %s309_s30  ;;  %p315_p13 = scmp.lt.s32.totalorder %s309_s30, %s309_s30 }
  0x1c   :  { %p316_p0 = por %p315_p13, %p314_p12 }
  0x1e   :  { %p317_p1 = pnand %p316_p0, %p310_p11 }
  0x20   :  { %320 = shalt.err (!%p317_p1)
}
  0x21   :  { %29 = dma.hbm_to_vmem [thread:$0]  %s439_s1, 128, %s27_s12, [#allocation6]  }
  0x22   :  { %343 = dma.done.wait [#allocation3], 64  }
  0x23   :  { %344 = vsyncadd [#allocation3], 4294967232 }
  0x24   :  { %345 = dma.done.wait [#allocation6], 128  }
  0x25   :  { %346 = vsyncadd [#allocation6], 4294967168  ;;  %v351_v0 = vmov 2   ;;  %v352_v1 = vmov 0   ;;  %v36_v2 = vld [vmem:[#allocation2] sm:$0xf]  ;;  %v43_v9 = vlaneseq }
  0x26   :  { %266 = vset.pattern.permute.xlu1 %v351_v0  ;;  %264 = vset.pattern.permute.xlu0 %v352_v1  ;;  %v353_v3 = vmov 3   ;;  %v354_v4 = vmov 1   ;;  %v355_v5 = vmov 4   ;;  %v356_v6 = vmov 5   ;;  %v37_v16 = vld [vmem:[#allocation5] sm:$0xff]  ;;  %s365_s1 = smov [#allocation7]  }
  0x27   :  { %59 = vperm.xlu1 %266, %v36_v2   ;;  %40 = vperm.xlu0 %264, %v36_v2   ;;  %v357_v7 = vmov 6   ;;  %v358_v8 = vmov 7   ;;  %v44_v10 = vshrl.u32 %v43_v9, 7  ;;  %v359_v62 = vmov 2102212464   ;;  %s229_s4 = sshll.u32 %s365_s1, 4  ;;  %s230_s4 = int_to_ptr.vmem [resolvable:$true] %s229_s4 }
  0x28   :  { %v360_v0 = vmov 920167782   ;;  %s321_s5 = scalar_lea.vmem %s230_s4, 64  ;;  %p326_p3 = scmp.lt.s32.totalorder %s230_s4, %s230_s4 }
  0x29   :  { %v45_v11 = vsub.s32 0, %v44_v10  ;;  %v54_v12 = vsub.s32 1, %v44_v10  ;;  %v64_v13 = vsub.s32 2, %v44_v10  ;;  %v74_v18 = vsub.s32 3, %v44_v10  ;;  %p322_p2 = scmp.ne.s32.totalorder %s230_s4, %s321_s5  ;;  %p327_p4 = scmp.lt.s32.totalorder %s321_s5, %s321_s5 }
  0x2a   :  { %v84_v20 = vsub.s32 4, %v44_v10  ;;  %v94_v24 = vsub.s32 5, %v44_v10  ;;  %v104_v32 = vsub.s32 6, %v44_v10  ;;  %v114_v41 = vsub.s32 7, %v44_v10 }
  0x2b   :  { %267 = vset.pattern.permute.xlu1 %v353_v3  ;;  %265 = vset.pattern.permute.xlu0 %v354_v4  ;;  %v46_v17 = vrot.slane %v37_v16, %v45_v11  ;;  %v55_v19 = vrot.slane %v37_v16, %v54_v12  ;;  %v65_v21 = vrot.slane %v37_v16, %v64_v13  ;;  %v361_v4 = vmov 1326507024   ;;  %p328_p5 = por %p327_p4, %p326_p3 }
  0x2c   :  { %69 = vperm.xlu1 %267, %v36_v2   ;;  %49 = vperm.xlu0 %265, %v36_v2   ;;  %v75_v26 = vrot.slane %v37_v16, %v74_v18  ;;  %v85_v28 = vrot.slane %v37_v16, %v84_v20  ;;  %v95_v31 = vrot.slane %v37_v16, %v94_v24  ;;  %v364_v11 = vmov 2131351028  }
  0x2d   :  { %v105_v40 = vrot.slane %v37_v16, %v104_v32  ;;  %v115_v46 = vrot.slane %v37_v16, %v114_v41  ;;  %p329_p6 = pnand %p328_p5, %p322_p2 }
  0x30   :  { %268 = vset.pattern.permute.xlu1 %v355_v5  ;;  %269 = vset.pattern.permute.xlu0 %v356_v6  ;;  %v362_v6 = vmov 683565275  }
  0x31   :  { %79 = vperm.xlu1 %268, %v36_v2   ;;  %89 = vperm.xlu0 %269, %v36_v2  }
  0x35   :  { %270 = vset.pattern.permute.xlu1 %v357_v7  ;;  %272 = vset.pattern.permute.xlu0 %v358_v8 }
  0x36   :  { %99 = vperm.xlu1 %270, %v36_v2  }
  0x3a   :  { %271 = vset.pattern.permute.xlu1 %v358_v8  ;;  %v363_v8 = vmov 2475754826  }
  0x3b   :  { %109 = vperm.xlu1 %271, %v36_v2  }
  0xa6   :  { %v60_v14 = vpop.permute.xlu1 %59  ;;  %v41_v15 = vpop.permute.xlu0 %40 }
  0xa7   :  { %v47_v25 = vmul.f32 %v46_v17, %v41_v15  ;;  %v66_v29 = vmul.f32 %v65_v21, %v60_v14 }
  0xab   :  { %v70_v22 = vpop.permute.xlu1 %69  ;;  %v50_v23 = vpop.permute.xlu0 %49 }
  0xac   :  { %v56_v27 = vmul.f32 %v55_v19, %v50_v23  ;;  %v76_v33 = vmul.f32 %v75_v26, %v70_v22 }
  0xae   :  { %v57_v30 = vadd.f32 %v56_v27, %v47_v25 }
  0xb0   :  { %v67_v34 = vadd.f32 %v66_v29, %v57_v30  ;;  %v80_v35 = vpop.permute.xlu1 %79  ;;  %v90_v36 = vpop.permute.xlu0 %89 }
  0xb1   :  { %v86_v37 = vmul.f32 %v85_v28, %v80_v35  ;;  %v96_v39 = vmul.f32 %v95_v31, %v90_v36 }
  0xb2   :  { %v77_v38 = vadd.f32 %v76_v33, %v67_v34 }
  0xb4   :  { %v87_v42 = vadd.f32 %v86_v37, %v77_v38 }
  0xb5   :  { %v100_v43 = vpop.permute.xlu1 %99 }
  0xb6   :  { %v97_v44 = vadd.f32 %v96_v39, %v87_v42  ;;  %v106_v45 = vmul.f32 %v105_v40, %v100_v43 }
  0xb8   :  { %v107_v48 = vadd.f32 %v106_v45, %v97_v44 }
  0xba   :  { %v110_v47 = vpop.permute.xlu1 %109 }
  0xbb   :  { %v116_v49 = vmul.f32 %v115_v46, %v110_v47 }
  0xbd   :  { %v405_v50 = vadd.f32 %v116_v49, %v107_v48 }
  0xbf   :  { %v121_v51 = vand.u32 2139095040, %v405_v50  ;;  %v118_v52 = vand.u32 2147483647, %v405_v50  ;;  %vm120_vm7 = vcmp.lt.s32.totalorder %v405_v50, 0  ;;  %vm210_vm12 = vweird.f32 %v405_v50 }
  0xc1   :  { %v122_v53 = vshrl.u32 %v121_v51, 23  ;;  %v125_v55 = vand.u32 8388607, %v118_v52  ;;  %vm119_vm8 = vcmp.le.f32.partialorder %v118_v52, 0.7853982 }
  0xc3   :  { %v239_v54 = vadd.s32 4294967169, %v122_v53  ;;  %v126_v58 = vor.u32 8388608, %v125_v55 }
  0xc5   :  { %v128_v56 = vadd.s32 1, %v239_v54  ;;  %v166_v2 = vshll.u32 %v126_v58, 8 }
  0xc7   :  { %vm129_vm0 = vcmp.gt.s32.totalorder %v128_v56, 0 }
  0xc8   :  { %v130_v57 = vsel %vm129_vm0, %v128_v56, 0 }
  0xc9   :  { %v132_v59 = vand.u32 31, %v130_v57  ;;  %v131_v60 = vshrl.u32 %v130_v57, 5 }
  0xcb   :  { %v133_v61 = vsub.s32 32, %v132_v59  ;;  %v144_v63 = vshll.u32 %v359_v62, %v132_v59  ;;  %v147_v1 = vshll.u32 %v360_v0, %v132_v59  ;;  %v135_v7 = vshll.u32 %v362_v6, %v132_v59 }
  0xcc   :  { %v138_v10 = vshll.u32 %v363_v8, %v132_v59  ;;  %v141_v13 = vshll.u32 %v364_v11, %v132_v59  ;;  %vm153_vm1 = vcmp.lt.s32.totalorder %v131_v60, 4  ;;  %vm150_vm2 = vcmp.lt.s32.totalorder %v131_v60, 1 }
  0xcd   :  { %v145_v3 = vshrl.u32 %v360_v0, %v133_v61  ;;  %v148_v5 = vshrl.u32 %v361_v4, %v133_v61  ;;  %v136_v9 = vshrl.u32 %v363_v8, %v133_v61  ;;  %v139_v12 = vshrl.u32 %v364_v11, %v133_v61 }
  0xce   :  { %v142_v14 = vshrl.u32 %v359_v62, %v133_v61  ;;  %v134_v18 = vshrl.u32 %v362_v6, %v133_v61  ;;  %vm151_vm3 = vcmp.lt.s32.totalorder %v131_v60, 2  ;;  %vm152_vm4 = vcmp.lt.s32.totalorder %v131_v60, 3 }
  0xcf   :  { %v146_v15 = vor.u32 %v145_v3, %v144_v63  ;;  %v149_v16 = vor.u32 %v148_v5, %v147_v1  ;;  %v137_v17 = vor.u32 %v136_v9, %v135_v7  ;;  %v140_v19 = vor.u32 %v139_v12, %v138_v10 }
  0xd0   :  { %v143_v20 = vor.u32 %v142_v14, %v141_v13 }
  0xd1   :  { %v159_v21 = vsel %vm153_vm1, %v146_v15, 920167782  ;;  %v163_v22 = vsel %vm153_vm1, %v149_v16, 1326507024  ;;  %v158_v24 = vsel %vm150_vm2, %v137_v17, %v140_v19  ;;  %v154_v27 = vsel %vm150_vm2, %v134_v18, %v137_v17 }
  0xd2   :  { %v155_v23 = vsel %vm153_vm1, %v143_v20, 2102212464  ;;  %v160_v25 = vsel %vm152_vm4, %v143_v20, %v159_v21  ;;  %v162_v26 = vsel %vm150_vm2, %v140_v19, %v143_v20  ;;  %v164_v30 = vsel %vm152_vm4, %v146_v15, %v163_v22 }
  0xd3   :  { %v156_v28 = vsel %vm152_vm4, %v140_v19, %v155_v23  ;;  %v161_v29 = vsel %vm151_vm3, %v158_v24, %v160_v25  ;;  %v165_v31 = vsel %vm151_vm3, %v162_v26, %v164_v30 }
  0xd4   :  { %v411_v32 = vmul.u32.u64.low %v166_v2, %v161_v29  ;;  %v412_v33 = vmul.u32.u64.high %v166_v2, %v161_v29, %v411_v32  ;;  %v414_v34 = vmul.u32.u64.low %v166_v2, %v165_v31  ;;  %v415_v35 = vmul.u32.u64.high %v166_v2, %v165_v31, %v414_v34 }
  0xd5   :  { %v157_v36 = vsel %vm151_vm3, %v154_v27, %v156_v28 }
  0xd6   :  { %v176_v37 = vadd.s32 1, %v412_v33  ;;  %v173_v38 = vmul.u32 %v166_v2, %v157_v36  ;;  %vm175_vm5 = vc.u32 %v415_v35, %v411_v32  ;;  %v174_v51 = vadd.s32 %v411_v32, %v415_v35 }
  0xd8   :  { %v177_v39 = vsel %vm175_vm5, %v176_v37, %v412_v33 }
  0xd9   :  { %v178_v40 = vadd.s32 %v177_v39, %v173_v38 }
  0xdb   :  { %v179_v41 = vadd.s32 536870912, %v178_v40 }
  0xdd   :  { %v180_v42 = vshrl.u32 %v179_v41, 30 }
  0xdf   :  { %v181_v43 = vshll.u32 %v180_v42, 30  ;;  %v204_v0 = vsub.s32 4, %v180_v42 }
  0xe1   :  { %v182_v44 = vsub.s32 %v178_v40, %v181_v43  ;;  %v205_v3 = vsel %vm120_vm7, %v204_v0, %v180_v42 }
  0xe2   :  { %v207_v5 = vsel %vm119_vm8, 0, %v205_v3 }
  0xe3   :  { %v184_v45 = vsub.s32 0, %v182_v44  ;;  %v211_v6 = vadd.s32 3, %v207_v5 }
  0xe5   :  { %v240_v46 = vmin.u32 %v184_v45, %v182_v44  ;;  %v212_v7 = vand.u32 3, %v211_v6 }
  0xe7   :  { %v186_v47 = vclz %v240_v46  ;;  %vm217_vm9 = vcmp.eq.s32.totalorder %v212_v7, 2  ;;  %vm214_vm10 = vcmp.eq.s32.totalorder %v212_v7, 0  ;;  %vm213_vm11 = vcmp.lt.s32.totalorder %v212_v7, 2 }
  0xe9   :  { %v241_v48 = vadd.s32 4294967294, %v186_v47 }
  0xeb   :  { %vm242_vm6 = vcmp.lt.s32.totalorder %v241_v48, 0 }
  0xec   :  { %v189_v49 = vsel %vm242_vm6, 0, %v241_v48 }
  0xed   :  { %v190_v53 = vsub.s32 32, %v189_v49  ;;  %v194_v54 = vsub.s32 4294967266, %v189_v49  ;;  %v191_v55 = vshll.u32 %v182_v44, %v189_v49 }
  0xef   :  { %v192_v56 = vshrl.u32 %v174_v51, %v190_v53  ;;  %v195_v57 = vadd.s32 127, %v194_v54 }
  0xf1   :  { %v193_v58 = vor.u32 %v192_v56, %v191_v55  ;;  %v196_v59 = vshll.u32 %v195_v57, 23 }
  0xf3   :  { %v197_v60 = vor.u32 4788187, %v196_v59  ;;  %v200_v62 = vcvt.s32.f32 %v193_v58 }
  0xf5   :  { %v198_v61 = vand.u32 2147483647, %v197_v60 }
  0xf7   :  { %v201_v63 = vmul.f32 %v200_v62, %v198_v61 }
  0xf9   :  { %v202_v1 = vxor.u32 2147483648, %v201_v63 }
  0xfb   :  { %v203_v2 = vsel %vm120_vm7, %v202_v1, %v201_v63 }
  0xfc   :  { %v206_v4 = vsel %vm119_vm8, %v405_v50, %v203_v2 }
  0xfd   :  { %273 = vcosq.f32 %v206_v4 }
  0xfe   :  { %275 = vsinq.f32 %v206_v4 }
 0x107   :  { %v274_v8 = vpop.eup %273 }
 0x108   :  { %v276_v9 = vpop.eup %275  ;;  %v218_v10 = vxor.u32 2147483648, %v274_v8 }
 0x109   :  { %v215_v11 = vxor.u32 2147483648, %v276_v9 }
 0x10a   :  { %v219_v12 = vsel %vm217_vm9, %v218_v10, %v276_v9 }
 0x10b   :  { %v216_v52 = vsel %vm214_vm10, %v274_v8, %v215_v11 }
 0x10c   :  { %v220_v13 = vsel %vm213_vm11, %v216_v52, %v219_v12 }
 0x10d   :  { %v221_v14 = vsel %vm210_vm12, nan, %v220_v13 }
 0x10e   :  { %222 = vst [vmem:[#allocation7] sm:$0xf] %v221_v14 }
 0x10f   :  { %332 = shalt.err (!%p329_p6)
}
 0x110   :  { %s333_s8 = scalar_lea.hbm %s440_s2, 64 }
 0x111   :  { %p334_p7 = scmp.ne.s32.totalorder %s440_s2, %s333_s8  ;;  %p337_p8 = scmp.lt.u32.totalorder %s333_s8, %s440_s2 }
 0x113   :  { %p339_p9 = pnand %p337_p8, %p334_p7 }
 0x115   :  { %342 = shalt.err (!%p339_p9)
}
 0x116   :  { %232 = dma.vmem_to_hbm [thread:$0]  %s230_s4, 64, %s440_s2, [#allocation4]  }
 0x117   :  { %347 = dma.done.wait [#allocation4], 64  }
 0x118   :  { %348 = vsyncadd [#allocation4], 4294967232 }
 0x119   :  { %236 = vsyncpa [#allocation3], 1 }
 0x11a   :  { %237 = vsyncpa [#allocation6], 1 }
 0x11b   :  { %238 = vsyncpa [#allocation4], 1 }

</bundles_post_ra>
